<compile_context>
chip_gen: v5e
topology: v5e:2x2
jax: 0.10.0
libtpu: 0.0.40
codegen_flags: <defaults>
</compile_context>

<pallas_src>
import functools

import jax
import jax.numpy as jnp
from jax.experimental import pallas as pl
from jax.experimental.pallas import tpu as pltpu


# ---------------------------------------------------------------------------
# Kernels
# ---------------------------------------------------------------------------


def _shared_mlp(v, w1t, w2):
    """sharedMLP on pooled stats. v: (Bt, T, 1) f32; w1t, w2: (T, Hd) f32."""
    # h[b, 0, j] = sum_t W1[j, t] * v[b, t]
    h = jnp.maximum(jnp.sum(w1t[None] * v, axis=1, keepdims=True), 0.0)  # (Bt,1,Hd)
    # out[b, t, 0] = sum_j W2[t, j] * h[b, 0, j]
    return jnp.sum(w2[None] * h, axis=2, keepdims=True)                  # (Bt,T,1)


def _ta_fused_kernel(w1t_ref, w2_ref, x_ref, o_ref, *, inv_s, s_valid, s_pad):
    """Fused pooling + MLP + sigmoid + scale + ReLU on one (Bt, T, Sp) slab."""
    x = x_ref[...]                                   # (Bt, T, Sp), native dtype
    w1t = w1t_ref[...]                               # (T, Hd) f32
    w2 = w2_ref[...]                                 # (T, Hd) f32

    # Mean pool: f32 accumulation; zero padding contributes nothing and the
    # normalization uses the true (unpadded) element count.
    avg = jnp.sum(x, axis=-1, keepdims=True, dtype=jnp.float32) * inv_s  # (Bt,T,1)

    # Max pool: exact in the native dtype; padded lanes masked to -inf.
    if s_valid != s_pad:
        lane = jax.lax.broadcasted_iota(jnp.int32, x.shape, x.ndim - 1)
        x_for_max = jnp.where(lane < s_valid, x, jnp.asarray(-jnp.inf, x.dtype))
    else:
        x_for_max = x
    mx = jnp.max(x_for_max, axis=-1, keepdims=True).astype(jnp.float32)  # (Bt,T,1)

    att = jax.nn.sigmoid(_shared_mlp(avg, w1t, w2) + _shared_mlp(mx, w1t, w2))

    # out = ReLU(att * x), broadcast over the lane-dense Sp dim, in x.dtype.
    o_ref[...] = jnp.maximum(att.astype(x.dtype) * x, 0.0).astype(o_ref.dtype)


def _ta_pool_kernel(w1t_ref, w2_ref, x_ref, att_ref, sum_acc, max_acc,
                    *, inv_s, s_valid, s_tile, padded):
    """Pass 1 of the large-S fallback: S-tiled pooling, MLP at the last step."""
    s = pl.program_id(1)

    @pl.when(s == 0)
    def _():
        sum_acc[...] = jnp.zeros_like(sum_acc)
        max_acc[...] = jnp.full_like(max_acc, -jnp.inf)

    x = x_ref[...]                                   # (1, T, St)
    sum_acc[...] += jnp.sum(x, axis=-1, keepdims=True, dtype=jnp.float32)

    if padded:                                       # pad lanes only in last tile
        lane = jax.lax.broadcasted_iota(jnp.int32, x.shape, 2) + s * s_tile
        x = jnp.where(lane < s_valid, x, jnp.asarray(-jnp.inf, x.dtype))
    max_acc[...] = jnp.maximum(
        max_acc[...], jnp.max(x, axis=-1, keepdims=True).astype(jnp.float32))

    @pl.when(s == pl.num_programs(1) - 1)
    def _():
        w1t = w1t_ref[...]
        w2 = w2_ref[...]
        avg = sum_acc[...] * inv_s
        mx = max_acc[...]
        att_ref[...] = jax.nn.sigmoid(
            _shared_mlp(avg, w1t, w2) + _shared_mlp(mx, w1t, w2))


def _ta_scale_kernel(att_ref, x_ref, o_ref):
    """Pass 2 of the large-S fallback: out = ReLU(att * x) on (1, T, St)."""
    x = x_ref[...]
    att = att_ref[...].astype(x.dtype)               # (1, T, 1)
    o_ref[...] = jnp.maximum(att * x, 0.0).astype(o_ref.dtype)


# ---------------------------------------------------------------------------
# Block-size / VMEM-budget helpers
# ---------------------------------------------------------------------------


def _vmem_budget():
    """(working-set budget for pipelined blocks, requested vmem_limit_bytes)."""
    try:
        cap = int(pltpu.get_tpu_info().vmem_capacity_bytes)
    except Exception:
        cap = 64 << 20            # conservative default (v7x physical VMEM)
    cap = max(cap, 32 << 20)
    working = int(cap * 0.70)     # 2x(in block) + 2x(out block) must fit here
    limit = int(cap * 0.85)       # scoped VMEM limit request (with headroom)
    return working, limit


def _round_up(n, m):
    return ((n + m - 1) // m) * m


def _pick_batch_block(B, per_batch_bytes, working_budget):
    """Largest divisor of B whose double-buffered in+out blocks fit the budget,
    keeping >= 2 grid steps when B >= 2 (v7x megacore sharding)."""
    bt = max(1, min(B, working_budget // (4 * per_batch_bytes)))
    while B % bt:
        bt -= 1
    if B >= 2 and B // bt < 2:
        bt = max(1, B // 2)
        while B % bt:
            bt -= 1
    return bt


def _pick_s_tile(s_pad, T, itemsize, working_budget):
    """Largest 128-multiple divisor of padded S whose double-buffered in+out
    (1, T, St) blocks fit the budget."""
    m = s_pad // 128
    k = max(1, min(m, working_budget // (4 * T * 128 * itemsize)))
    while m % k:
        k -= 1
    return 128 * k


# ---------------------------------------------------------------------------
# Wrapper
# ---------------------------------------------------------------------------


def ta_forward(x, w1, w2, *, working_budget_bytes=None):
    """TA.forward (fbs=False path): ReLU(TimeAttention(x) * x).

    x : (B, T, C, H, W)
    w1: (Hd, T)  -- Conv3d(T, Hd, 1, bias=False).weight with 1x1x1 dims squeezed
    w2: (T, Hd)  -- Conv3d(Hd, T, 1, bias=False).weight with 1x1x1 dims squeezed
    """
    # TODO(synk): the fbs=True branch (return only the attention map) is not
    # exposed by this wrapper; default fbs=False semantics are implemented.
    B, T, C, H, W = x.shape
    S = C * H * W
    Hd = w1.shape[0]
    itemsize = jnp.dtype(x.dtype).itemsize

    # Lane-dense layout: flatten (C, H, W) and pad the lane dim to a multiple
    # of 128 (unmasked vld/vst). Zero padding is masked for the max pool.
    Sp = _round_up(S, 128)
    x_flat = x.reshape(B, T, S)
    if Sp != S:
        x_flat = jnp.pad(x_flat, ((0, 0), (0, 0), (0, Sp - S)))

    w1t = jnp.asarray(w1, jnp.float32).T              # (T, Hd)
    w2f = jnp.asarray(w2, jnp.float32)                # (T, Hd)

    working, vmem_limit = _vmem_budget()
    if working_budget_bytes is not None:
        working = int(working_budget_bytes)

    per_batch_bytes = T * Sp * itemsize
    make_params = functools.partial(pltpu.CompilerParams,
                                    vmem_limit_bytes=vmem_limit)

    if 4 * per_batch_bytes <= working:
        # ----- fused single-pass path: one HBM read + one write of x. -----
        Bt = _pick_batch_block(B, per_batch_bytes, working)
        grid = (B // Bt,)
        kernel = functools.partial(
            _ta_fused_kernel, inv_s=1.0 / float(S), s_valid=S, s_pad=Sp)
        out_flat = pl.pallas_call(
            kernel,
            out_shape=jax.ShapeDtypeStruct((B, T, Sp), x.dtype),
            grid_spec=pltpu.PrefetchScalarGridSpec(
                num_scalar_prefetch=0,
                grid=grid,
                in_specs=[
                    pl.BlockSpec((T, Hd), lambda b: (0, 0)),     # W1^T (resident)
                    pl.BlockSpec((T, Hd), lambda b: (0, 0)),     # W2   (resident)
                    pl.BlockSpec((Bt, T, Sp), lambda b: (b, 0, 0)),
                ],
                out_specs=pl.BlockSpec((Bt, T, Sp), lambda b: (b, 0, 0)),
            ),
            compiler_params=make_params(dimension_semantics=("parallel",)),
        )(w1t, w2f, x_flat)
    else:
        # ----- large-S fallback: S-tiled pooling+MLP, then scale+ReLU. -----
        St = _pick_s_tile(Sp, T, itemsize, working)
        n_s = Sp // St

        pool_kernel = functools.partial(
            _ta_pool_kernel, inv_s=1.0 / float(S), s_valid=S, s_tile=St,
            padded=(Sp != S))
        att = pl.pallas_call(
            pool_kernel,
            out_shape=jax.ShapeDtypeStruct((B, T, 1), jnp.float32),
            grid_spec=pltpu.PrefetchScalarGridSpec(
                num_scalar_prefetch=0,
                grid=(B, n_s),
                in_specs=[
                    pl.BlockSpec((T, Hd), lambda b, s: (0, 0)),
                    pl.BlockSpec((T, Hd), lambda b, s: (0, 0)),
                    pl.BlockSpec((1, T, St), lambda b, s: (b, 0, s)),
                ],
                out_specs=pl.BlockSpec((1, T, 1), lambda b, s: (b, 0, 0)),
                scratch_shapes=[pltpu.VMEM((1, T, 1), jnp.float32),
                                pltpu.VMEM((1, T, 1), jnp.float32)],
            ),
            compiler_params=make_params(
                dimension_semantics=("parallel", "arbitrary")),
        )(w1t, w2f, x_flat)

        out_flat = pl.pallas_call(
            _ta_scale_kernel,
            out_shape=jax.ShapeDtypeStruct((B, T, Sp), x.dtype),
            grid_spec=pltpu.PrefetchScalarGridSpec(
                num_scalar_prefetch=0,
                grid=(B, n_s),
                in_specs=[
                    pl.BlockSpec((1, T, 1), lambda b, s: (b, 0, 0)),
                    pl.BlockSpec((1, T, St), lambda b, s: (b, 0, s)),
                ],
                out_specs=pl.BlockSpec((1, T, St), lambda b, s: (b, 0, s)),
            ),
            compiler_params=make_params(
                dimension_semantics=("parallel", "parallel")),
        )(att, x_flat)

    if Sp != S:
        out_flat = out_flat[:, :, :S]
    return out_flat.reshape(B, T, C, H, W)


# ---------------------------------------------------------------------------
# Reference + tests
# ---------------------------------------------------------------------------


def _reference(x, w1, w2):
    """Pure-JAX reference matching the PyTorch TA.forward (fbs=False)."""
    xf = x.astype(jnp.float32)
    avg = jnp.mean(xf, axis=(2, 3, 4))                       # (B, T)
    mx = jnp.max(xf, axis=(2, 3, 4))                         # (B, T)

    def mlp(v):                                              # (B, T) -> (B, T)
        h = jnp.maximum(v @ w1.astype(jnp.float32).T, 0.0)   # (B, Hd)
        return h @ w2.astype(jnp.float32).T                  # (B, T)

    att = jax.nn.sigmoid(mlp(avg) + mlp(mx))                 # (B, T)
    out = jnp.maximum(att[:, :, None, None, None] * xf, 0.0)
    return out.astype(x.dtype)


if __name__ == "__main__":
    key = jax.random.PRNGKey(0)
    k_x, k_w1, k_w2, k_x2 = jax.random.split(key, 4)

    # Shapes consistent with the module: timeWindows=8, t_ratio=4 (Hd=2).
    T, T_RATIO = 8, 4
    HD = T // T_RATIO
    w1 = 0.3 * jax.random.normal(k_w1, (HD, T), dtype=jnp.float32)
    w2 = 0.3 * jax.random.normal(k_w2, (T, HD), dtype=jnp.float32)

    def check(x, name, atol=1e-4, rtol=1e-4, **kw):
        out = jax.block_until_ready(ta_forward(x, w1, w2, **kw))
        ref = _reference(x, w1, w2)
        assert out.shape == x.shape, (name, out.shape)
        o32 = out.astype(jnp.float32)
        r32 = ref.astype(jnp.float32)
        err = float(jnp.max(jnp.abs(o32 - r32)))
        assert bool(jnp.allclose(o32, r32, atol=atol, rtol=rtol)), (name, err)

    # 1) fused single-pass path, lane-dense S = 4*16*16 = 1024 (128 multiple).
    x = jax.random.normal(k_x, (2, T, 4, 16, 16), dtype=jnp.float32)
    check(x, "fused_f32")

    # 2) bf16 input: exercises the no-f32-block-temp path (max in bf16,
    #    sum accumulated in f32, scale/ReLU in bf16).
    check(x.astype(jnp.bfloat16), "fused_bf16", atol=5e-2, rtol=5e-2)

    # 3) S = 3*10*10 = 300 (not a 128 multiple): lane padding + masked max.
    x3 = jax.random.normal(k_x2, (2, T, 3, 10, 10), dtype=jnp.float32)
    check(x3, "fused_padded")

    # 4) forced two-pass fallback (S-tiled pooling + scale) via a tiny budget.
    check(x, "two_pass_fallback", working_budget_bytes=64 * 1024)

    print("KERNEL_OK")
</pallas_src>

<mosaic_0001>
module attributes {stable_mosaic.version = 11 : i64} {
  func.func @_ta_fused_kernel(%arg0: i32, %arg1: memref<8x2xf32, #tpu.memory_space<vmem>>, %arg2: memref<8x2xf32, #tpu.memory_space<vmem>>, %arg3: memref<1x8x1024xf32, #tpu.memory_space<vmem>>, %arg4: memref<1x8x1024xf32, #tpu.memory_space<vmem>>) attributes {dimension_semantics = [#tpu.dimension_semantics<parallel>], iteration_bounds = array<i64: 2>, scalar_prefetch = 0 : i64, scratch_operands = 0 : i64, tpu.core_type = #tpu.core_type<tc>, window_params = [{pipeline_mode = #tpu.pipeline_mode<synchronous>, transform_indices = @transform_0, window_bounds = array<i64: 8, 2>}, {pipeline_mode = #tpu.pipeline_mode<synchronous>, transform_indices = @transform_1, window_bounds = array<i64: 8, 2>}, {transform_indices = @transform_2, window_bounds = array<i64: 1, 8, 1024>}, {transform_indices = @transform_3, window_bounds = array<i64: 1, 8, 1024>}]} {
    %c0 = arith.constant 0 : index
    %c0_0 = arith.constant 0 : index
    %c0_1 = arith.constant 0 : index
    %0 = vector.load %arg3[%c0, %c0_0, %c0_1] : memref<1x8x1024xf32, #tpu.memory_space<vmem>>, vector<1x8x1024xf32>
    %c0_2 = arith.constant 0 : index
    %c0_3 = arith.constant 0 : index
    %1 = vector.load %arg1[%c0_2, %c0_3] : memref<8x2xf32, #tpu.memory_space<vmem>>, vector<8x2xf32>
    %c0_4 = arith.constant 0 : index
    %c0_5 = arith.constant 0 : index
    %2 = vector.load %arg2[%c0_4, %c0_5] : memref<8x2xf32, #tpu.memory_space<vmem>>, vector<8x2xf32>
    %cst = arith.constant dense<0.000000e+00> : vector<1x8xf32>
    %3 = vector.multi_reduction <add>, %0, %cst [2] : vector<1x8x1024xf32> to vector<1x8xf32>
    %4 = vector.shape_cast %3 : vector<1x8xf32> to vector<1x8x1xf32>
    %cst_6 = arith.constant 9.765625E-4 : f32
    %5 = vector.broadcast %cst_6 : f32 to vector<1x8x1xf32>
    %6 = arith.mulf %4, %5 : vector<1x8x1xf32>
    %cst_7 = arith.constant dense<0xFF800000> : vector<1x8xf32>
    %7 = vector.multi_reduction <maximumf>, %0, %cst_7 [2] : vector<1x8x1024xf32> to vector<1x8xf32>
    %8 = vector.shape_cast %7 : vector<1x8xf32> to vector<1x8x1xf32>
    %9 = vector.shape_cast %1 : vector<8x2xf32> to vector<1x8x2xf32>
    %10 = vector.broadcast %6 : vector<1x8x1xf32> to vector<1x8x2xf32>
    %11 = arith.mulf %9, %10 : vector<1x8x2xf32>
    %cst_8 = arith.constant dense<0.000000e+00> : vector<1x2xf32>
    %12 = vector.multi_reduction <add>, %11, %cst_8 [1] : vector<1x8x2xf32> to vector<1x2xf32>
    %13 = vector.shape_cast %12 : vector<1x2xf32> to vector<1x1x2xf32>
    %cst_9 = arith.constant 0.000000e+00 : f32
    %14 = vector.broadcast %cst_9 : f32 to vector<1x1x2xf32>
    %15 = arith.maximumf %13, %14 : vector<1x1x2xf32>
    %16 = vector.shape_cast %2 : vector<8x2xf32> to vector<1x8x2xf32>
    %17 = vector.broadcast %15 : vector<1x1x2xf32> to vector<1x8x2xf32>
    %18 = arith.mulf %16, %17 : vector<1x8x2xf32>
    %cst_10 = arith.constant dense<0.000000e+00> : vector<1x8xf32>
    %19 = vector.multi_reduction <add>, %18, %cst_10 [2] : vector<1x8x2xf32> to vector<1x8xf32>
    %20 = vector.shape_cast %19 : vector<1x8xf32> to vector<1x8x1xf32>
    %21 = vector.shape_cast %1 : vector<8x2xf32> to vector<1x8x2xf32>
    %22 = vector.broadcast %8 : vector<1x8x1xf32> to vector<1x8x2xf32>
    %23 = arith.mulf %21, %22 : vector<1x8x2xf32>
    %cst_11 = arith.constant dense<0.000000e+00> : vector<1x2xf32>
    %24 = vector.multi_reduction <add>, %23, %cst_11 [1] : vector<1x8x2xf32> to vector<1x2xf32>
    %25 = vector.shape_cast %24 : vector<1x2xf32> to vector<1x1x2xf32>
    %cst_12 = arith.constant 0.000000e+00 : f32
    %26 = vector.broadcast %cst_12 : f32 to vector<1x1x2xf32>
    %27 = arith.maximumf %25, %26 : vector<1x1x2xf32>
    %28 = vector.shape_cast %2 : vector<8x2xf32> to vector<1x8x2xf32>
    %29 = vector.broadcast %27 : vector<1x1x2xf32> to vector<1x8x2xf32>
    %30 = arith.mulf %28, %29 : vector<1x8x2xf32>
    %cst_13 = arith.constant dense<0.000000e+00> : vector<1x8xf32>
    %31 = vector.multi_reduction <add>, %30, %cst_13 [2] : vector<1x8x2xf32> to vector<1x8xf32>
    %32 = vector.shape_cast %31 : vector<1x8xf32> to vector<1x8x1xf32>
    %33 = arith.addf %20, %32 : vector<1x8x1xf32>
    %34 = arith.negf %33 : vector<1x8x1xf32>
    %35 = math.exp %34 : vector<1x8x1xf32>
    %cst_14 = arith.constant 1.000000e+00 : f32
    %36 = vector.broadcast %cst_14 : f32 to vector<1x8x1xf32>
    %37 = arith.addf %36, %35 : vector<1x8x1xf32>
    %38 = arith.divf %36, %37 : vector<1x8x1xf32>
    %39 = vector.broadcast %38 : vector<1x8x1xf32> to vector<1x8x1024xf32>
    %40 = arith.mulf %39, %0 : vector<1x8x1024xf32>
    %cst_15 = arith.constant 0.000000e+00 : f32
    %41 = vector.broadcast %cst_15 : f32 to vector<1x8x1024xf32>
    %42 = arith.maximumf %40, %41 : vector<1x8x1024xf32>
    %c0_16 = arith.constant 0 : index
    %c0_17 = arith.constant 0 : index
    %c0_18 = arith.constant 0 : index
    %43 = vector.load %arg4[%c0_16, %c0_17, %c0_18] : memref<1x8x1024xf32, #tpu.memory_space<vmem>>, vector<1x8x1024xf32>
    tpu.vector_store %arg4[%c0_16, %c0_17, %c0_18], %42 {strides = array<i32>} : memref<1x8x1024xf32, #tpu.memory_space<vmem>>, vector<1x8x1024xf32>,
    return
  }
  func.func @transform_0(%arg0: i32) -> (i32, i32) {
    %c0_i32 = arith.constant 0 : i32
    %c0_i32_0 = arith.constant 0 : i32
    %c0_i32_1 = arith.constant 0 : i32
    return %c0_i32, %c0_i32_0 : i32, i32
  }
  func.func @transform_1(%arg0: i32) -> (i32, i32) {
    %c0_i32 = arith.constant 0 : i32
    %c0_i32_0 = arith.constant 0 : i32
    %c0_i32_1 = arith.constant 0 : i32
    return %c0_i32, %c0_i32_0 : i32, i32
  }
  func.func @transform_2(%arg0: i32) -> (i32, i32, i32) {
    %c0_i32 = arith.constant 0 : i32
    %c0_i32_0 = arith.constant 0 : i32
    %c0_i32_1 = arith.constant 0 : i32
    return %arg0, %c0_i32, %c0_i32_0 : i32, i32, i32
  }
  func.func @transform_3(%arg0: i32) -> (i32, i32, i32) {
    %c0_i32 = arith.constant 0 : i32
    %c0_i32_0 = arith.constant 0 : i32
    %c0_i32_1 = arith.constant 0 : i32
    return %arg0, %c0_i32, %c0_i32_0 : i32, i32, i32
  }
}

</mosaic_0001>

<bundles_post_ra>
// kernel: tpu_custom_call.1
= control target key start
LH: loop header
LB: loop body
LE: loop exit
PB: predicated region body
PF: predicated region fallthrough
CT: control target
= control target key end

     0   :  { %8 = vsyncpa [#allocation3], 0  ;;  %s742_s0 = inlined_call_operand.vmem [shape: f32[8,2], index: 0, kind: input, shape index: {}]   ;;  %s743_s1 = inlined_call_operand.vmem [shape: f32[8,2], index: 1, kind: input, shape index: {}]   ;;  %s744_s2 = inlined_call_operand.hbm [shape: f32[2,8,1024], index: 2, kind: input, shape index: {}]   ;;  %s745_s3 = inlined_call_operand.hbm [shape: f32[2,8,1024], index: 3, kind: output, shape index: {}]  }
   0x1   :  { %10 = vsyncpa [#allocation3 + $0x1], 0 }
   0x2   :  { %11 = vsyncpa [#allocation4], 0 }
   0x3   :  { %13 = vsyncpa [#allocation4 + $0x1], 0  ;;  %s561_s12 = smov 0   ;;  %s563_s13 = smov 0  }
   0x4   :  { %s565_s14 = smov 0   ;;  %s567_s15 = smov 0  }
   0x5 LB: > { %s582_s16 = sadd.s32 4294967295, %s539_s15   ;;  %s376_s17 = sadd.s32 4294967294, %s539_s15   ;;  %s539_s15 = sphi %s567_s15, %s755_s15   ;;  %s535_s14 = sphi %s565_s14, %s754_s14   ;;  %s531_s13 = sphi %s563_s13, %s753_s13   ;;  %s527_s12 = sphi %s561_s12, %s752_s12  }
   0x6   : > { %s586_s18 = sadd.s32 1, %s539_s15   ;;  %s68_s19 = sadd.s32 1, %s535_s14 }
   0x7   : > { %s65_s20 = ssub.s32 %s539_s15, %s586_s18  ;;  %p75_p0 = scmp.ne.s32.totalorder %s535_s14, %s531_s13 }
   0x8   : > { %p66_p1 = scmp.eq.s32.totalorder %s65_s20, 0  ;;  %p76_p2 = scmp.eq.s32.totalorder %s539_s15, 0 }
   0x9   : > { %p81_p3 = scmp.ne.s32.totalorder %s531_s13, %s527_s12  ;;  %p82_p4 = scmp.eq.s32.totalorder %s582_s16, 0 }
   0xa   : > { %s598_s21 = scalar_select %p66_p1, %s535_s14, %s68_s19  }
   0xb   : > { %p600_p5 = por %p76_p2, %p75_p0  ;;  %p604_p6 = por %p82_p4, %p81_p3 }
   0xc   : > { %p105_p7 = scmp.eq.s32.totalorder %s582_s16, 1  ;;  %p111_p8 = scmp.eq.s32.totalorder %s376_s17, 1 }
   0xd   : > { %p405_p10 = scmp.lt.s32.totalorder %s539_s15, 2  ;;  %s137_s26 = sand.u32 1, %s535_s14  }
   0xe   : > { %p611_p11 = por %p105_p7, %p75_p0  ;;  %p615_p12 = por %p111_p8, %p81_p3 }
   0xf   : > { %s391_s27 = sshll.u32 %s539_s15, 6  ;;  %s379_s28 = sshll.u32 %s137_s26, 6 }
  0x10   : > { %s146_s4 = scalar_lea.hbm %s744_s2, %s391_s27  ;;  %s141_s6 = scalar_lea.vmem [#allocation2], %s379_s28 }
  0x11   : > { %s148_s5 = sshll.u32 %s146_s4, 4  ;;  %s150_s7 = sshll.u32 %s141_s6, 4  ;;  %s149_s5 = int_to_ptr.hbm [resolvable:$true] %s148_s5  ;;  %s151_s7 = int_to_ptr.vmem [resolvable:$true] %s150_s7 }
  0x12   : > { %p626_p13 = pnand %p405_p10, %p600_p5  ;;  %p382_p0 = scmp.ge.s32.totalorder %s539_s15, 1 }
  0x13   : > { %p155_p1 = scmp.lt.s32.totalorder %s539_s15, 3  ;;  %s138_s9 = scalar_lea.sflag [#allocation3], %s137_s26 }
  0x14   : > { %s443_s10 = sshra.s32 %s149_s5, 4  ;;  %p447_p3 = pneg %p626_p13  ;;  %s444_s10 = int_to_ptr.hbm [resolvable:$true] %s443_s10 }
  0x15   : > { %s445_s11 = scalar_lea.hbm %s444_s10, 64  ;;  %s450_s20 = scalar_lea.hbm %s744_s2, 128 }
  0x16   : > { %p446_p2 = scmp.ne.s32.totalorder %s444_s10, %s445_s11  ;;  %p451_p5 = scmp.lt.s32.totalorder %s444_s10, %s744_s2 }
  0x17   : > { %p452_p8 = scmp.lt.s32.totalorder %s450_s20, %s445_s11 }
  0x18   : > { %p448_p4 = pnand %p447_p3, %p446_p2 }
  0x19   : > { %p453_p10 = por %p452_p8, %p451_p5 }
  0x1a   : > { %p449_p7 = pneg %p448_p4 }
  0x1c   : > { %p454_p9 = pnand %p453_p10, %p449_p7 }
  0x1e   : > { %457 = shalt.err (!%p454_p9)
}
  0x1f   : > { %400 = dma.hbm_to_vmem [thread:$0]  (!%p626_p13), %s149_s5, 1024, %s151_s7, %s138_s9  }
  0x20   : > { %p156_p2 = pnand %p382_p0, %p155_p1 }
  0x21   : > { %s647_s26 = sand.u32 (!%p156_p2), 1, %s531_s13  }
  0x22   : > { %159 = sbr.rel (%p156_p2) target bundleno = 361 (0x169), region = 32  ;;  %s383_s28 = sshll.u32 (!%p156_p2), %s647_s26, 6 }
  0x23   : > { %s162_s29 = scalar_lea.sflag (!%p156_p2), [#allocation3], %s647_s26  ;;  %s165_s30 = scalar_lea.vmem (!%p156_p2), [#allocation2], %s383_s28 }
  0x27   : > { %518 = dma.done.wait (%p604_p6), %s162_s29, 1024  }
  0x28   : > { %520 = vsyncadd (%p604_p6), %s162_s29, 4294966272  ;;  %v657_v0 = vld [vmem:[%s165_s30] sm:$0xff]  ;;  %v659_v1 = vld [vmem:[%s165_s30 + $0x8] sm:$0xff]  ;;  %vm219_vm0 = vcmask 15360   ;;  %s392_s7 = sshll.u32 %s582_s16, 6  ;;  %s188_s11 = scalar_lea.vmem [#allocation5], %s383_s28 }
  0x29   : > { %v661_v2 = vld [vmem:[%s165_s30 + $0x10] sm:$0xff]  ;;  %v199_v3 = vadd.f32 %v659_v1, %v657_v0  ;;  %v665_v4 = vld [vmem:[%s165_s30 + $0x18] sm:$0xff]  ;;  %v668_v6 = vld [vmem:[%s165_s30 + $0x20] sm:$0xff]  ;;  %s301_s10 = scalar_lea.hbm %s745_s3, %s392_s7  ;;  %s303_s16 = sshll.u32 %s188_s11, 4  ;;  %s304_s16 = int_to_ptr.vmem [resolvable:$true] %s303_s16 }
  0x2a   : > { %v671_v8 = vld [vmem:[%s165_s30 + $0x28] sm:$0xff]  ;;  %v674_v10 = vld [vmem:[%s165_s30 + $0x30] sm:$0xff]  ;;  %v677_v12 = vld [vmem:[%s165_s30 + $0x38] sm:$0xff]  ;;  %v209_v13 = vmax.f32 %v657_v0, %v668_v6  ;;  %s305_s17 = sshll.u32 %s301_s10, 4  ;;  %s290_s19 = scalar_lea.sflag [#allocation4], %s647_s26  ;;  %s306_s17 = int_to_ptr.hbm [resolvable:$true] %s305_s17 }
  0x2b   : > { %v200_v5 = vadd.f32 %v199_v3, %v661_v2  ;;  %v212_v15 = vmax.f32 %v665_v4, %v677_v12  ;;  %v210_v16 = vmax.f32 %v659_v1, %v671_v8  ;;  %v211_v17 = vmax.f32 %v661_v2, %v674_v10  ;;  %v197_v23 = vld [vmem:[%s742_s0] sm:$0xff]  ;;  %s487_s20 = sshra.s32 %s306_s17, 4  ;;  %s493_s29 = scalar_lea.hbm %s745_s3, 128  ;;  %s488_s20 = int_to_ptr.hbm [resolvable:$true] %s487_s20 }
  0x2c   : > { %v198_v39 = vld [vmem:[%s743_s1] sm:$0xff]  ;;  %s489_s22 = scalar_lea.hbm %s488_s20, 64  ;;  %p494_p0 = scmp.lt.s32.totalorder %s488_s20, %s745_s3 }
  0x2d   : > { %v201_v7 = vadd.f32 %v200_v5, %v665_v4  ;;  %v213_v19 = vmax.f32 %v209_v13, %v210_v16  ;;  %v214_v20 = vmax.f32 %v211_v17, %v212_v15  ;;  %p490_p6 = scmp.ne.s32.totalorder %s488_s20, %s489_s22  ;;  %p495_p1 = scmp.lt.s32.totalorder %s493_s29, %s489_s22 }
  0x2f   : > { %v202_v9 = vadd.f32 %v201_v7, %v668_v6  ;;  %v215_v21 = vmax.f32 %v213_v19, %v214_v20  ;;  %p491_p9 = pnand %p490_p6, %p611_p11  ;;  %p496_p3 = por %p495_p1, %p494_p0 }
  0x31   : > { %v203_v11 = vadd.f32 %v202_v9, %v671_v8  ;;  %p492_p13 = pneg %p491_p9 }
  0x33   : > { %v204_v14 = vadd.f32 %v203_v11, %v674_v10  ;;  %p497_p4 = pnand %p496_p3, %p492_p13 }
  0x35   : > { %v205_v18 = vadd.f32 %v204_v14, %v677_v12 }
  0x37   : > { %206 = vadd.xlane.f32.xlu0 %v205_v18 }
  0x3f   : > { %216 = vmax.xlane.f32.xlu0 %v215_v21 }
  0xaa   : > { %v207_v22 = vpop.xlane.xlu0 %206 }
  0xab   : > { %v208_v24 = vmul.f32 0.0009765625, %v207_v22 }
  0xad   : > { %v218_v25 = vmul.f32 %v208_v24, %v197_v23 }
  0xaf   : > { %v220_v26 = vsel %vm219_vm0, %v218_v25, 0.0 }
  0xb0   : > { %v221_v27 = vrot.slane %v220_v26, 4 }
  0xb2   : > { %v222_v28 = vadd.f32 %v221_v27, %v220_v26  ;;  %v217_v29 = vpop.xlane.xlu0 %216 }
  0xb3   : > { %v232_v30 = vmul.f32 %v217_v29, %v197_v23 }
  0xb4   : > { %v223_v31 = vrot.slane %v222_v28, 2 }
  0xb5   : > { %v233_v32 = vsel %vm219_vm0, %v232_v30, 0.0 }
  0xb6   : > { %v234_v33 = vrot.slane %v233_v32, 4  ;;  %v224_v34 = vadd.f32 %v223_v31, %v222_v28 }
  0xb8   : > { %v235_v35 = vadd.f32 %v234_v33, %v233_v32  ;;  %v225_v36 = vrot.slane %v224_v34, 1 }
  0xba   : > { %v236_v37 = vrot.slane %v235_v35, 2  ;;  %v226_v38 = vadd.f32 %v225_v36, %v224_v34 }
  0xbc   : > { %v237_v40 = vadd.f32 %v236_v37, %v235_v35  ;;  %v227_v41 = vmax.f32 %v226_v38, 0.0 }
  0xbe   : > { %v228_v42 = vmul.f32 %v227_v41, %v198_v39  ;;  %v238_v43 = vrot.slane %v237_v40, 1 }
  0xc0   : > { %v229_v44 = vsel %vm219_vm0, %v228_v42, 0.0  ;;  %v239_v45 = vadd.f32 %v238_v43, %v237_v40 }
  0xc1   : > { %230 = vadd.xlane.f32.xlu1 %v229_v44 }
  0xc2   : > { %v240_v46 = vmax.f32 %v239_v45, 0.0 }
  0xc4   : > { %v241_v47 = vmul.f32 %v240_v46, %v198_v39 }
  0xc6   : > { %v242_v48 = vsel %vm219_vm0, %v241_v47, 0.0 }
  0xc9   : > { %243 = vadd.xlane.f32.xlu1 %v242_v48 }
 0x134   : > { %v231_v49 = vpop.xlane.xlu1 %230 }
 0x13c   : > { %v244_v50 = vpop.xlane.xlu1 %243 }
 0x13d   : > { %v245_v51 = vadd.f32 %v244_v50, %v231_v49 }
 0x13f   : > { %v385_v52 = vmul.f32 -1.442695, %v245_v51 }
 0x141   : > { %439 = vpow2.f32 %v385_v52 }
 0x147   : > { %v440_v53 = vpop.eup %439 }
 0x148   : > { %v249_v54 = vadd.f32 1.0, %v440_v53 }
 0x14a   : > { %441 = vrcp.f32 %v249_v54  ;;  %v261_v58 = vand.u32 2147483648, %v249_v54  ;;  %v259_v60 = vand.u32 2147483647, %v249_v54  ;;  %vm255_vm2 = vweird.f32 %v249_v54 }
 0x14c   : > { %v262_v62 = vor.u32 1.1754944e-38, %v261_v58  ;;  %vm260_vm4 = vcmp.eq.f32.partialorder %v259_v60, 8.507059e+37 }
 0x150   : > { %v442_v55 = vpop.eup %441 }
 0x151   : > { %v251_v56 = vmul.f32 %v442_v55, %v249_v54  ;;  %vm256_vm1 = vweird.f32 %v442_v55 }
 0x152   : > { %vm257_vm3 = vmor %vm255_vm2, %vm256_vm1 }
 0x153   : > { %v252_v57 = vsub.f32 1.0, %v251_v56 }
 0x155   : > { %v253_v59 = vmul.f32 %v442_v55, %v252_v57 }
 0x157   : > { %v254_v61 = vadd.f32 %v442_v55, %v253_v59 }
 0x159   : > { %v258_v63 = vsel %vm257_vm3, %v442_v55, %v254_v61 }
 0x15a   : > { %v263_v3 = vsel %vm260_vm4, %v262_v62, %v258_v63 }
 0x15b   : > { %v265_v5 = vmul.f32 %v263_v3, %v657_v0  ;;  %v266_v7 = vmul.f32 %v263_v3, %v659_v1  ;;  %v267_v9 = vmul.f32 %v263_v3, %v661_v2  ;;  %v268_v11 = vmul.f32 %v263_v3, %v665_v4 }
 0x15c   : > { %v269_v13 = vmul.f32 %v263_v3, %v668_v6  ;;  %v270_v14 = vmul.f32 %v263_v3, %v671_v8  ;;  %v271_v15 = vmul.f32 %v263_v3, %v674_v10  ;;  %v272_v19 = vmul.f32 %v263_v3, %v677_v12 }
 0x15d   : > { %v273_v16 = vmax.f32 %v265_v5, 0.0  ;;  %v274_v17 = vmax.f32 %v266_v7, 0.0  ;;  %v275_v18 = vmax.f32 %v267_v9, 0.0  ;;  %v276_v20 = vmax.f32 %v268_v11, 0.0 }
 0x15e   : > { %v277_v0 = vmax.f32 %v269_v13, 0.0  ;;  %v278_v1 = vmax.f32 %v270_v14, 0.0  ;;  %v279_v2 = vmax.f32 %v271_v15, 0.0  ;;  %v280_v4 = vmax.f32 %v272_v19, 0.0 }
 0x15f   : > { %281 = vst [vmem:[%s188_s11] sm:$0xff] %v273_v16 }
 0x160   : > { %282 = vst [vmem:[%s188_s11 + $0x8] sm:$0xff] %v274_v17 }
 0x161   : > { %283 = vst [vmem:[%s188_s11 + $0x10] sm:$0xff] %v275_v18 }
 0x162   : > { %284 = vst [vmem:[%s188_s11 + $0x18] sm:$0xff] %v276_v20 }
 0x163   : > { %285 = vst [vmem:[%s188_s11 + $0x20] sm:$0xff] %v277_v0 }
 0x164   : > { %286 = vst [vmem:[%s188_s11 + $0x28] sm:$0xff] %v278_v1 }
 0x165   : > { %287 = vst [vmem:[%s188_s11 + $0x30] sm:$0xff] %v279_v2 }
 0x166   : > { %288 = vst [vmem:[%s188_s11 + $0x38] sm:$0xff] %v280_v4 }
 0x167   : > { %500 = shalt.err (!%p497_p4)
}
 0x168   : > { %395 = dma.vmem_to_hbm [thread:$0]  (%p611_p11), %s304_s16, 1024, %s306_s17, %s290_s19  }
 0x169 PF: > { %s317_s26 = sand.u32 1, %s527_s12   ;;  %p751_p7 = scmp.ge.s32.totalorder %s539_s15, 2 }
 0x16a   : > { %s318_s4 = scalar_lea.sflag [#allocation4], %s317_s26 }
 0x16b   : > { %p402_p5 = pnand %p751_p7, %p615_p12 }
 0x16d   : > { %p403_p8 = pneg %p402_p5 }
 0x16f   : > { %522 = dma.done.wait (%p403_p8), %s318_s4, 1024  }
 0x170   : > { %524 = vsyncadd (%p403_p8), %s318_s4, 4294966272  ;;  %p16_p10 = scmp.ge.s32.totalorder %s586_s18, 4   ;;  %s752_s12 = smov %s531_s13 }
 0x171   : > { %s753_s13 = smov %s535_s14  ;;  %s754_s14 = smov %s598_s21 }
 0x172   : > { %s755_s15 = smov %s586_s18  ;;  %18 = sbr.rel (!%p16_p10) target bundleno = 5 (0x5), region = 77 }
 0x177   :  { %324 = vsyncpa [#allocation3], 1 }
 0x178   :  { %326 = vsyncpa [#allocation3 + $0x1], 1 }
 0x179   :  { %327 = vsyncpa [#allocation4], 1 }
 0x17a   :  { %329 = vsyncpa [#allocation4 + $0x1], 1 }

</bundles_post_ra>
